<compile_context>
chip_gen: v5e
topology: v5e:2x2
jax: 0.10.0
libtpu: 0.0.40
codegen_flags: <defaults>
</compile_context>

<pallas_src>
import functools

import jax
import jax.numpy as jnp
from jax.experimental import pallas as pl
from jax.experimental.pallas import tpu as pltpu


def _spiking_seq_kernel(x_ref, w1_ref, b1_ref, w2_ref, b2_ref, out_ref,
                        v1_ref, v2_ref, i1_ref, s1_ref,
                        *, decay1, thr1, decay2, thr2,
                        t_blk, n_x_chunks, n_chunks):
    t_chunk = pl.program_id(1)

    # Reset membrane state at the start of each batch-block's time sweep
    # (equivalent to SpikingSequential.reset_state() before forward).
    # Requires the time-chunk grid axis to be innermost -- see module note.
    @pl.when(t_chunk == 0)
    def _():
        v1_ref[...] = jnp.zeros_like(v1_ref)
        v2_ref[...] = jnp.zeros_like(v2_ref)

    tb = x_ref.shape[1]        # batch block
    d_in = x_ref.shape[2]
    d_out = w2_ref.shape[1]

    # ---- Hoisted Linear1 over the whole chunk ------------------------------
    # One (T_BLK*TB, D_in) @ (D_in, H) MXU matmul, bf16 in / f32 accumulate.
    # Chunks entirely beyond the real input length see zero input, so their
    # Linear1 output is just the bias -- skip the matmul and the (clamped,
    # re-read) x DMA contribution entirely.
    def _linear1():
        x2d = x_ref[...].reshape(t_blk * tb, d_in)          # already bf16
        i1_ref[...] = jnp.dot(x2d, w1_ref[...],
                              preferred_element_type=jnp.float32) + b1_ref[...]

    if n_x_chunks < n_chunks:
        @pl.when(t_chunk < n_x_chunks)
        def _():
            _linear1()

        @pl.when(t_chunk >= n_x_chunks)
        def _():
            i1_ref[...] = jnp.broadcast_to(b1_ref[...], i1_ref.shape)
    else:
        _linear1()

    # ---- LIF1 recurrence (VPU only); spikes -> lane-dense bf16 slab --------
    v1 = v1_ref[...]
    for step in range(t_blk):                       # unrolled, static slices
        i1 = i1_ref[step * tb:(step + 1) * tb, :]
        v1 = decay1 * v1 + i1
        m1 = v1 > thr1
        s1_ref[step * tb:(step + 1) * tb, :] = m1.astype(s1_ref.dtype)
        v1 = jnp.where(m1, 0.0, v1)
    v1_ref[...] = v1                                # persists across chunks

    # ---- Hoisted Linear2: ONE (T_BLK*TB, H) @ (H, D_out) MXU matmul --------
    i2_all = jnp.dot(s1_ref[...], w2_ref[...],
                     preferred_element_type=jnp.float32) + b2_ref[...]

    # ---- LIF2 recurrence; spikes stored directly into the output slab ------
    v2 = v2_ref[...]
    for step in range(t_blk):
        i2 = i2_all[step * tb:(step + 1) * tb, :]
        v2 = decay2 * v2 + i2
        m2 = v2 > thr2
        out_ref[0, :, step * d_out:(step + 1) * d_out] = m2.astype(out_ref.dtype)
        v2 = jnp.where(m2, 0.0, v2)
    v2_ref[...] = v2                                # persists across chunks


def spiking_sequential_forward(x, w1, b1, w2, b2, *, time_steps=100,
                               decay1=0.9, thr1=1.0, decay2=0.9, thr2=1.0,
                               t_blk=32, batch_block=None,
                               vmem_limit_bytes=None):
    """x: (T, B, D_in) float32 0/1 spikes. Returns (time_steps, B, D_out) bf16 spikes.

    For real workloads: t_blk in 32-64 (but <= T to avoid in-HBM zero fill),
    batch_block a multiple of 128 (ideally 256 on v6e/v7x) with >= 2 batch
    blocks, and raise vmem_limit_bytes when enlarging tiles on v5e/v6e.
    """
    T, B, D_in = x.shape
    H = w1.shape[1]
    D_out = w2.shape[1]

    if batch_block is None:
        # Prefer >=2 batch blocks (v7x megacore), multiple of 8 sublanes,
        # capped at 256 (MXU row dim).
        batch_block = B
        for cand in (256, 128, 64, 32, 16, 8):
            if cand < B and B % cand == 0:
                batch_block = cand
                break
    assert B % batch_block == 0, (B, batch_block)
    assert batch_block == B or batch_block % 8 == 0, batch_block
    nb = B // batch_block

    n_chunks = pl.cdiv(time_steps, t_blk)

    # Container semantics: input_t = x[t] if t < T else zeros.  Only the real
    # input data is stored/DMA'd; it is padded at most to the next t_blk
    # multiple.  Chunks beyond n_x_chunks are handled in-kernel (bias only).
    t_used = min(T, n_chunks * t_blk)
    n_x_chunks = max(1, pl.cdiv(t_used, t_blk))
    x = x[:t_used]
    x_pad = n_x_chunks * t_blk
    if x_pad > t_used:
        x = jnp.pad(x, ((0, x_pad - t_used), (0, 0), (0, 0)))

    # bf16 matmul inputs (spikes/weights), f32 biases & membrane state.
    x_bf = x.astype(jnp.bfloat16)
    w1_bf = w1.astype(jnp.bfloat16)
    w2_bf = w2.astype(jnp.bfloat16)
    b1_2d = b1.reshape(1, H).astype(jnp.float32)
    b2_2d = b2.reshape(1, D_out).astype(jnp.float32)

    kernel = functools.partial(
        _spiking_seq_kernel,
        decay1=float(decay1), thr1=float(thr1),
        decay2=float(decay2), thr2=float(thr2),
        t_blk=t_blk, n_x_chunks=n_x_chunks, n_chunks=n_chunks)

    # Clamped x index_map: padded chunks re-target the last real chunk (its
    # DMA is cheap and its data is ignored by the in-kernel pl.when gate).
    x_index_map = lambda b, t: (jnp.minimum(t, n_x_chunks - 1), b, 0)

    compiler_kwargs = dict(dimension_semantics=("parallel", "arbitrary"))
    if vmem_limit_bytes is not None:
        compiler_kwargs["vmem_limit_bytes"] = int(vmem_limit_bytes)

    out = pl.pallas_call(
        kernel,
        out_shape=jax.ShapeDtypeStruct((n_chunks, B, t_blk * D_out),
                                       jnp.bfloat16),
        grid_spec=pltpu.PrefetchScalarGridSpec(
            num_scalar_prefetch=0,
            grid=(nb, n_chunks),                       # (batch, time-chunk)
            in_specs=[
                pl.BlockSpec((t_blk, batch_block, D_in), x_index_map),  # x (bf16)
                pl.BlockSpec((D_in, H), lambda b, t: (0, 0)),           # W1 (bf16)
                pl.BlockSpec((1, H), lambda b, t: (0, 0)),              # b1 (f32)
                pl.BlockSpec((H, D_out), lambda b, t: (0, 0)),          # W2 (bf16)
                pl.BlockSpec((1, D_out), lambda b, t: (0, 0)),          # b2 (f32)
            ],
            out_specs=pl.BlockSpec((1, batch_block, t_blk * D_out),
                                   lambda b, t: (t, b, 0)),
            scratch_shapes=[
                pltpu.VMEM((batch_block, H), jnp.float32),          # LIF1 membrane
                pltpu.VMEM((batch_block, D_out), jnp.float32),      # LIF2 membrane
                pltpu.VMEM((t_blk * batch_block, H), jnp.float32),  # Linear1 out slab
                pltpu.VMEM((t_blk * batch_block, H), jnp.bfloat16), # LIF1 spike slab
            ],
        ),
        compiler_params=pltpu.CompilerParams(**compiler_kwargs),
    )(x_bf, w1_bf, b1_2d, w2_bf, b2_2d)

    # (n_chunks, B, t_blk*D_out) -> (time_steps, B, D_out)
    out = out.reshape(n_chunks, B, t_blk, D_out)
    out = jnp.transpose(out, (0, 2, 1, 3)).reshape(n_chunks * t_blk, B, D_out)
    return out[:time_steps]


def _reference_forward(x, w1, b1, w2, b2, *, time_steps,
                       decay1=0.9, thr1=1.0, decay2=0.9, thr2=1.0):
    """Pure-JAX reference of the same SpikingSequential forward.

    Same precision policy as the kernel (bf16 matmul inputs, f32 accumulation,
    f32 membrane state) so the 0/1 spike outputs match exactly.
    """
    T, B, D_in = x.shape
    H = w1.shape[1]
    D_out = w2.shape[1]
    if time_steps > T:
        x = jnp.pad(x, ((0, time_steps - T), (0, 0), (0, 0)))
    else:
        x = x[:time_steps]

    w1_bf = w1.astype(jnp.bfloat16)
    w2_bf = w2.astype(jnp.bfloat16)

    def step(carry, x_t):
        v1, v2 = carry
        i1 = jnp.dot(x_t.astype(jnp.bfloat16), w1_bf,
                     preferred_element_type=jnp.float32) + b1
        v1 = decay1 * v1 + i1
        m1 = v1 > thr1
        s1 = m1.astype(jnp.float32)
        v1 = jnp.where(m1, 0.0, v1)
        i2 = jnp.dot(s1.astype(jnp.bfloat16), w2_bf,
                     preferred_element_type=jnp.float32) + b2
        v2 = decay2 * v2 + i2
        m2 = v2 > thr2
        s2 = m2.astype(jnp.float32)
        v2 = jnp.where(m2, 0.0, v2)
        return (v1, v2), s2

    init = (jnp.zeros((B, H), jnp.float32), jnp.zeros((B, D_out), jnp.float32))
    _, out = jax.lax.scan(step, init, x)
    return out


if __name__ == "__main__":
    # Small shapes consistent with the forward: time-major 3-D input.
    # time_steps > T exercises the in-kernel "zero input -> bias only" path;
    # time_steps not a multiple of t_blk exercises the dropped chunk tail;
    # B=16 with default batch_block (-> 8) exercises the parallel batch axis.
    T, B, D_in, H, D_out = 8, 16, 32, 32, 32
    time_steps = 20

    key = jax.random.PRNGKey(0)
    kx, kw1, kb1, kw2, kb2 = jax.random.split(key, 5)

    x = (jax.random.uniform(kx, (T, B, D_in)) < 0.3).astype(jnp.float32)
    w1 = jax.random.normal(kw1, (D_in, H), jnp.float32) * 0.3
    b1 = jax.random.normal(kb1, (H,), jnp.float32) * 0.1
    w2 = jax.random.normal(kw2, (H, D_out), jnp.float32) * 0.3
    b2 = jax.random.normal(kb2, (D_out,), jnp.float32) * 0.1

    ref = _reference_forward(x, w1, b1, w2, b2, time_steps=time_steps)

    # Config 1: t_blk=8 (nb=2, two fully-padded time chunks).
    out = spiking_sequential_forward(x, w1, b1, w2, b2, time_steps=time_steps,
                                     t_blk=8)
    out = jax.block_until_ready(out)
    assert out.shape == (time_steps, B, D_out), out.shape
    assert jnp.allclose(out.astype(jnp.float32), ref, atol=1e-5), \
        "mismatch vs pure-JAX reference (t_blk=8)"

    # Config 2: t_blk=16, single batch block (nb=1), in-HBM tail pad inside
    # the first chunk plus one fully-padded chunk.
    out2 = spiking_sequential_forward(x, w1, b1, w2, b2, time_steps=time_steps,
                                      t_blk=16, batch_block=16)
    out2 = jax.block_until_ready(out2)
    assert out2.shape == (time_steps, B, D_out), out2.shape
    assert jnp.allclose(out2.astype(jnp.float32), ref, atol=1e-5), \
        "mismatch vs pure-JAX reference (t_blk=16)"

    print("KERNEL_OK")
</pallas_src>

<mosaic_0001>
module attributes {stable_mosaic.version = 11 : i64} {
  func.func @_spiking_seq_kernel(%arg0: i32, %arg1: i32, %arg2: memref<8x8x32xbf16, #tpu.memory_space<vmem>>, %arg3: memref<32x32xbf16, #tpu.memory_space<vmem>>, %arg4: memref<1x32xf32, #tpu.memory_space<vmem>>, %arg5: memref<32x32xbf16, #tpu.memory_space<vmem>>, %arg6: memref<1x32xf32, #tpu.memory_space<vmem>>, %arg7: memref<1x8x256xbf16, #tpu.memory_space<vmem>>, %arg8: memref<8x32xf32, #tpu.memory_space<vmem>>, %arg9: memref<8x32xf32, #tpu.memory_space<vmem>>, %arg10: memref<64x32xf32, #tpu.memory_space<vmem>>, %arg11: memref<64x32xbf16, #tpu.memory_space<vmem>>) attributes {dimension_semantics = [#tpu.dimension_semantics<parallel>, #tpu.dimension_semantics<arbitrary>], iteration_bounds = array<i64: 2, 3>, scalar_prefetch = 0 : i64, scratch_operands = 4 : i64, tpu.core_type = #tpu.core_type<tc>, window_params = [{transform_indices = @transform_0, window_bounds = array<i64: 8, 8, 32>}, {pipeline_mode = #tpu.pipeline_mode<synchronous>, transform_indices = @transform_1, window_bounds = array<i64: 32, 32>}, {pipeline_mode = #tpu.pipeline_mode<synchronous>, transform_indices = @transform_2, window_bounds = array<i64: 1, 32>}, {pipeline_mode = #tpu.pipeline_mode<synchronous>, transform_indices = @transform_3, window_bounds = array<i64: 32, 32>}, {pipeline_mode = #tpu.pipeline_mode<synchronous>, transform_indices = @transform_4, window_bounds = array<i64: 1, 32>}, {transform_indices = @transform_5, window_bounds = array<i64: 1, 8, 256>}]} {
    %c0_i32 = arith.constant 0 : i32
    %0 = arith.cmpi eq, %arg1, %c0_i32 : i32
    %1 = arith.extui %0 : i1 to i32
    %c0_i32_0 = arith.constant 0 : i32
    %2 = arith.cmpi ne, %1, %c0_i32_0 : i32
    scf.if %2 {
      %cst_108 = arith.constant 0.000000e+00 : f32
      %227 = vector.broadcast %cst_108 : f32 to vector<8x32xf32>
      %c0_109 = arith.constant 0 : index
      %c0_110 = arith.constant 0 : index
      %228 = vector.load %arg8[%c0_109, %c0_110] : memref<8x32xf32, #tpu.memory_space<vmem>>, vector<8x32xf32>
      tpu.vector_store %arg8[%c0_109, %c0_110], %227 {strides = array<i32>} : memref<8x32xf32, #tpu.memory_space<vmem>>, vector<8x32xf32>,
      %cst_111 = arith.constant 0.000000e+00 : f32
      %229 = vector.broadcast %cst_111 : f32 to vector<8x32xf32>
      %c0_112 = arith.constant 0 : index
      %c0_113 = arith.constant 0 : index
      %230 = vector.load %arg9[%c0_112, %c0_113] : memref<8x32xf32, #tpu.memory_space<vmem>>, vector<8x32xf32>
      tpu.vector_store %arg9[%c0_112, %c0_113], %229 {strides = array<i32>} : memref<8x32xf32, #tpu.memory_space<vmem>>, vector<8x32xf32>,
    } else {
    }
    %c1_i32 = arith.constant 1 : i32
    %3 = arith.cmpi slt, %arg1, %c1_i32 : i32
    %4 = arith.extui %3 : i1 to i32
    %c0_i32_1 = arith.constant 0 : i32
    %5 = arith.cmpi ne, %4, %c0_i32_1 : i32
    scf.if %5 {
      %c0_108 = arith.constant 0 : index
      %c0_109 = arith.constant 0 : index
      %c0_110 = arith.constant 0 : index
      %227 = vector.load %arg2[%c0_108, %c0_109, %c0_110] : memref<8x8x32xbf16, #tpu.memory_space<vmem>>, vector<8x8x32xbf16>
      %228 = vector.shape_cast %227 : vector<8x8x32xbf16> to vector<64x32xbf16>
      %c0_111 = arith.constant 0 : index
      %c0_112 = arith.constant 0 : index
      %229 = vector.load %arg3[%c0_111, %c0_112] : memref<32x32xbf16, #tpu.memory_space<vmem>>, vector<32x32xbf16>
      %cst_113 = arith.constant dense<0.000000e+00> : vector<64x32xf32>
      %230 = tpu.matmul %228, %229, %cst_113 {dimension_numbers = #tpu.dot_dimension_numbers<[1], [0], [0], [1], [0, 0, 1, 1], [], []>} : vector<64x32xbf16>, vector<32x32xbf16>, vector<64x32xf32> -> vector<64x32xf32>
      %c0_114 = arith.constant 0 : index
      %c0_115 = arith.constant 0 : index
      %231 = vector.load %arg4[%c0_114, %c0_115] : memref<1x32xf32, #tpu.memory_space<vmem>>, vector<1x32xf32>
      %232 = vector.broadcast %231 : vector<1x32xf32> to vector<64x32xf32>
      %233 = arith.addf %230, %232 : vector<64x32xf32>
      %c0_116 = arith.constant 0 : index
      %c0_117 = arith.constant 0 : index
      %234 = vector.load %arg10[%c0_116, %c0_117] : memref<64x32xf32, #tpu.memory_space<vmem>>, vector<64x32xf32>
      tpu.vector_store %arg10[%c0_116, %c0_117], %233 {strides = array<i32>} : memref<64x32xf32, #tpu.memory_space<vmem>>, vector<64x32xf32>,
    } else {
    }
    %c1_i32_2 = arith.constant 1 : i32
    %6 = arith.cmpi sge, %arg1, %c1_i32_2 : i32
    %7 = arith.extui %6 : i1 to i32
    %c0_i32_3 = arith.constant 0 : i32
    %8 = arith.cmpi ne, %7, %c0_i32_3 : i32
    scf.if %8 {
      %c0_108 = arith.constant 0 : index
      %c0_109 = arith.constant 0 : index
      %227 = vector.load %arg4[%c0_108, %c0_109] : memref<1x32xf32, #tpu.memory_space<vmem>>, vector<1x32xf32>
      %228 = vector.shape_cast %227 : vector<1x32xf32> to vector<1x32xf32>
      %229 = vector.broadcast %228 : vector<1x32xf32> to vector<64x32xf32>
      %c0_110 = arith.constant 0 : index
      %c0_111 = arith.constant 0 : index
      %230 = vector.load %arg10[%c0_110, %c0_111] : memref<64x32xf32, #tpu.memory_space<vmem>>, vector<64x32xf32>
      tpu.vector_store %arg10[%c0_110, %c0_111], %229 {strides = array<i32>} : memref<64x32xf32, #tpu.memory_space<vmem>>, vector<64x32xf32>,
    } else {
    }
    %c0 = arith.constant 0 : index
    %c0_4 = arith.constant 0 : index
    %9 = vector.load %arg8[%c0, %c0_4] : memref<8x32xf32, #tpu.memory_space<vmem>>, vector<8x32xf32>
    %c0_5 = arith.constant 0 : index
    %c0_6 = arith.constant 0 : index
    %10 = vector.load %arg10[%c0_5, %c0_6] : memref<64x32xf32, #tpu.memory_space<vmem>>, vector<8x32xf32>
    %cst = arith.constant 0.899999976 : f32
    %11 = vector.broadcast %cst : f32 to vector<8x32xf32>
    %12 = arith.mulf %11, %9 : vector<8x32xf32>
    %13 = arith.addf %12, %10 : vector<8x32xf32>
    %cst_7 = arith.constant 1.000000e+00 : f32
    %14 = vector.broadcast %cst_7 : f32 to vector<8x32xf32>
    %15 = arith.cmpf ogt, %13, %14 : vector<8x32xf32>
    %16 = arith.extui %15 : vector<8x32xi1> to vector<8x32xi32>
    %17 = arith.sitofp %16 : vector<8x32xi32> to vector<8x32xf32>
    %18 = arith.truncf %17 : vector<8x32xf32> to vector<8x32xbf16>
    %c0_8 = arith.constant 0 : index
    %c0_9 = arith.constant 0 : index
    %19 = vector.load %arg11[%c0_8, %c0_9] : memref<64x32xbf16, #tpu.memory_space<vmem>>, vector<8x32xbf16>
    tpu.vector_store %arg11[%c0_8, %c0_9], %18 {strides = array<i32>} : memref<64x32xbf16, #tpu.memory_space<vmem>>, vector<8x32xbf16>,
    %cst_10 = arith.constant 0.000000e+00 : f32
    %20 = vector.broadcast %cst_10 : f32 to vector<8x32xf32>
    %21 = arith.select %15, %20, %13 : vector<8x32xi1>, vector<8x32xf32>
    %c8 = arith.constant 8 : index
    %c0_11 = arith.constant 0 : index
    %22 = vector.load %arg10[%c8, %c0_11] : memref<64x32xf32, #tpu.memory_space<vmem>>, vector<8x32xf32>
    %cst_12 = arith.constant 0.899999976 : f32
    %23 = vector.broadcast %cst_12 : f32 to vector<8x32xf32>
    %24 = arith.mulf %23, %21 : vector<8x32xf32>
    %25 = arith.addf %24, %22 : vector<8x32xf32>
    %cst_13 = arith.constant 1.000000e+00 : f32
    %26 = vector.broadcast %cst_13 : f32 to vector<8x32xf32>
    %27 = arith.cmpf ogt, %25, %26 : vector<8x32xf32>
    %28 = arith.extui %27 : vector<8x32xi1> to vector<8x32xi32>
    %29 = arith.sitofp %28 : vector<8x32xi32> to vector<8x32xf32>
    %30 = arith.truncf %29 : vector<8x32xf32> to vector<8x32xbf16>
    %c8_14 = arith.constant 8 : index
    %c0_15 = arith.constant 0 : index
    %31 = vector.load %arg11[%c8_14, %c0_15] : memref<64x32xbf16, #tpu.memory_space<vmem>>, vector<8x32xbf16>
    tpu.vector_store %arg11[%c8_14, %c0_15], %30 {strides = array<i32>} : memref<64x32xbf16, #tpu.memory_space<vmem>>, vector<8x32xbf16>,
    %cst_16 = arith.constant 0.000000e+00 : f32
    %32 = vector.broadcast %cst_16 : f32 to vector<8x32xf32>
    %33 = arith.select %27, %32, %25 : vector<8x32xi1>, vector<8x32xf32>
    %c16 = arith.constant 16 : index
    %c0_17 = arith.constant 0 : index
    %34 = vector.load %arg10[%c16, %c0_17] : memref<64x32xf32, #tpu.memory_space<vmem>>, vector<8x32xf32>
    %cst_18 = arith.constant 0.899999976 : f32
    %35 = vector.broadcast %cst_18 : f32 to vector<8x32xf32>
    %36 = arith.mulf %35, %33 : vector<8x32xf32>
    %37 = arith.addf %36, %34 : vector<8x32xf32>
    %cst_19 = arith.constant 1.000000e+00 : f32
    %38 = vector.broadcast %cst_19 : f32 to vector<8x32xf32>
    %39 = arith.cmpf ogt, %37, %38 : vector<8x32xf32>
    %40 = arith.extui %39 : vector<8x32xi1> to vector<8x32xi32>
    %41 = arith.sitofp %40 : vector<8x32xi32> to vector<8x32xf32>
    %42 = arith.truncf %41 : vector<8x32xf32> to vector<8x32xbf16>
    %c16_20 = arith.constant 16 : index
    %c0_21 = arith.constant 0 : index
    %43 = vector.load %arg11[%c16_20, %c0_21] : memref<64x32xbf16, #tpu.memory_space<vmem>>, vector<8x32xbf16>
    tpu.vector_store %arg11[%c16_20, %c0_21], %42 {strides = array<i32>} : memref<64x32xbf16, #tpu.memory_space<vmem>>, vector<8x32xbf16>,
    %cst_22 = arith.constant 0.000000e+00 : f32
    %44 = vector.broadcast %cst_22 : f32 to vector<8x32xf32>
    %45 = arith.select %39, %44, %37 : vector<8x32xi1>, vector<8x32xf32>
    %c24 = arith.constant 24 : index
    %c0_23 = arith.constant 0 : index
    %46 = vector.load %arg10[%c24, %c0_23] : memref<64x32xf32, #tpu.memory_space<vmem>>, vector<8x32xf32>
    %cst_24 = arith.constant 0.899999976 : f32
    %47 = vector.broadcast %cst_24 : f32 to vector<8x32xf32>
    %48 = arith.mulf %47, %45 : vector<8x32xf32>
    %49 = arith.addf %48, %46 : vector<8x32xf32>
    %cst_25 = arith.constant 1.000000e+00 : f32
    %50 = vector.broadcast %cst_25 : f32 to vector<8x32xf32>
    %51 = arith.cmpf ogt, %49, %50 : vector<8x32xf32>
    %52 = arith.extui %51 : vector<8x32xi1> to vector<8x32xi32>
    %53 = arith.sitofp %52 : vector<8x32xi32> to vector<8x32xf32>
    %54 = arith.truncf %53 : vector<8x32xf32> to vector<8x32xbf16>
    %c24_26 = arith.constant 24 : index
    %c0_27 = arith.constant 0 : index
    %55 = vector.load %arg11[%c24_26, %c0_27] : memref<64x32xbf16, #tpu.memory_space<vmem>>, vector<8x32xbf16>
    tpu.vector_store %arg11[%c24_26, %c0_27], %54 {strides = array<i32>} : memref<64x32xbf16, #tpu.memory_space<vmem>>, vector<8x32xbf16>,
    %cst_28 = arith.constant 0.000000e+00 : f32
    %56 = vector.broadcast %cst_28 : f32 to vector<8x32xf32>
    %57 = arith.select %51, %56, %49 : vector<8x32xi1>, vector<8x32xf32>
    %c32 = arith.constant 32 : index
    %c0_29 = arith.constant 0 : index
    %58 = vector.load %arg10[%c32, %c0_29] : memref<64x32xf32, #tpu.memory_space<vmem>>, vector<8x32xf32>
    %cst_30 = arith.constant 0.899999976 : f32
    %59 = vector.broadcast %cst_30 : f32 to vector<8x32xf32>
    %60 = arith.mulf %59, %57 : vector<8x32xf32>
    %61 = arith.addf %60, %58 : vector<8x32xf32>
    %cst_31 = arith.constant 1.000000e+00 : f32
    %62 = vector.broadcast %cst_31 : f32 to vector<8x32xf32>
    %63 = arith.cmpf ogt, %61, %62 : vector<8x32xf32>
    %64 = arith.extui %63 : vector<8x32xi1> to vector<8x32xi32>
    %65 = arith.sitofp %64 : vector<8x32xi32> to vector<8x32xf32>
    %66 = arith.truncf %65 : vector<8x32xf32> to vector<8x32xbf16>
    %c32_32 = arith.constant 32 : index
    %c0_33 = arith.constant 0 : index
    %67 = vector.load %arg11[%c32_32, %c0_33] : memref<64x32xbf16, #tpu.memory_space<vmem>>, vector<8x32xbf16>
    tpu.vector_store %arg11[%c32_32, %c0_33], %66 {strides = array<i32>} : memref<64x32xbf16, #tpu.memory_space<vmem>>, vector<8x32xbf16>,
    %cst_34 = arith.constant 0.000000e+00 : f32
    %68 = vector.broadcast %cst_34 : f32 to vector<8x32xf32>
    %69 = arith.select %63, %68, %61 : vector<8x32xi1>, vector<8x32xf32>
    %c40 = arith.constant 40 : index
    %c0_35 = arith.constant 0 : index
    %70 = vector.load %arg10[%c40, %c0_35] : memref<64x32xf32, #tpu.memory_space<vmem>>, vector<8x32xf32>
    %cst_36 = arith.constant 0.899999976 : f32
    %71 = vector.broadcast %cst_36 : f32 to vector<8x32xf32>
    %72 = arith.mulf %71, %69 : vector<8x32xf32>
    %73 = arith.addf %72, %70 : vector<8x32xf32>
    %cst_37 = arith.constant 1.000000e+00 : f32
    %74 = vector.broadcast %cst_37 : f32 to vector<8x32xf32>
    %75 = arith.cmpf ogt, %73, %74 : vector<8x32xf32>
    %76 = arith.extui %75 : vector<8x32xi1> to vector<8x32xi32>
    %77 = arith.sitofp %76 : vector<8x32xi32> to vector<8x32xf32>
    %78 = arith.truncf %77 : vector<8x32xf32> to vector<8x32xbf16>
    %c40_38 = arith.constant 40 : index
    %c0_39 = arith.constant 0 : index
    %79 = vector.load %arg11[%c40_38, %c0_39] : memref<64x32xbf16, #tpu.memory_space<vmem>>, vector<8x32xbf16>
    tpu.vector_store %arg11[%c40_38, %c0_39], %78 {strides = array<i32>} : memref<64x32xbf16, #tpu.memory_space<vmem>>, vector<8x32xbf16>,
    %cst_40 = arith.constant 0.000000e+00 : f32
    %80 = vector.broadcast %cst_40 : f32 to vector<8x32xf32>
    %81 = arith.select %75, %80, %73 : vector<8x32xi1>, vector<8x32xf32>
    %c48 = arith.constant 48 : index
    %c0_41 = arith.constant 0 : index
    %82 = vector.load %arg10[%c48, %c0_41] : memref<64x32xf32, #tpu.memory_space<vmem>>, vector<8x32xf32>
    %cst_42 = arith.constant 0.899999976 : f32
    %83 = vector.broadcast %cst_42 : f32 to vector<8x32xf32>
    %84 = arith.mulf %83, %81 : vector<8x32xf32>
    %85 = arith.addf %84, %82 : vector<8x32xf32>
    %cst_43 = arith.constant 1.000000e+00 : f32
    %86 = vector.broadcast %cst_43 : f32 to vector<8x32xf32>
    %87 = arith.cmpf ogt, %85, %86 : vector<8x32xf32>
    %88 = arith.extui %87 : vector<8x32xi1> to vector<8x32xi32>
    %89 = arith.sitofp %88 : vector<8x32xi32> to vector<8x32xf32>
    %90 = arith.truncf %89 : vector<8x32xf32> to vector<8x32xbf16>
    %c48_44 = arith.constant 48 : index
    %c0_45 = arith.constant 0 : index
    %91 = vector.load %arg11[%c48_44, %c0_45] : memref<64x32xbf16, #tpu.memory_space<vmem>>, vector<8x32xbf16>
    tpu.vector_store %arg11[%c48_44, %c0_45], %90 {strides = array<i32>} : memref<64x32xbf16, #tpu.memory_space<vmem>>, vector<8x32xbf16>,
    %cst_46 = arith.constant 0.000000e+00 : f32
    %92 = vector.broadcast %cst_46 : f32 to vector<8x32xf32>
    %93 = arith.select %87, %92, %85 : vector<8x32xi1>, vector<8x32xf32>
    %c56 = arith.constant 56 : index
    %c0_47 = arith.constant 0 : index
    %94 = vector.load %arg10[%c56, %c0_47] : memref<64x32xf32, #tpu.memory_space<vmem>>, vector<8x32xf32>
    %cst_48 = arith.constant 0.899999976 : f32
    %95 = vector.broadcast %cst_48 : f32 to vector<8x32xf32>
    %96 = arith.mulf %95, %93 : vector<8x32xf32>
    %97 = arith.addf %96, %94 : vector<8x32xf32>
    %cst_49 = arith.constant 1.000000e+00 : f32
    %98 = vector.broadcast %cst_49 : f32 to vector<8x32xf32>
    %99 = arith.cmpf ogt, %97, %98 : vector<8x32xf32>
    %100 = arith.extui %99 : vector<8x32xi1> to vector<8x32xi32>
    %101 = arith.sitofp %100 : vector<8x32xi32> to vector<8x32xf32>
    %102 = arith.truncf %101 : vector<8x32xf32> to vector<8x32xbf16>
    %c56_50 = arith.constant 56 : index
    %c0_51 = arith.constant 0 : index
    %103 = vector.load %arg11[%c56_50, %c0_51] : memref<64x32xbf16, #tpu.memory_space<vmem>>, vector<8x32xbf16>
    tpu.vector_store %arg11[%c56_50, %c0_51], %102 {strides = array<i32>} : memref<64x32xbf16, #tpu.memory_space<vmem>>, vector<8x32xbf16>,
    %cst_52 = arith.constant 0.000000e+00 : f32
    %104 = vector.broadcast %cst_52 : f32 to vector<8x32xf32>
    %105 = arith.select %99, %104, %97 : vector<8x32xi1>, vector<8x32xf32>
    %c0_53 = arith.constant 0 : index
    %c0_54 = arith.constant 0 : index
    %106 = vector.load %arg8[%c0_53, %c0_54] : memref<8x32xf32, #tpu.memory_space<vmem>>, vector<8x32xf32>
    tpu.vector_store %arg8[%c0_53, %c0_54], %105 {strides = array<i32>} : memref<8x32xf32, #tpu.memory_space<vmem>>, vector<8x32xf32>,
    %c0_55 = arith.constant 0 : index
    %c0_56 = arith.constant 0 : index
    %107 = vector.load %arg11[%c0_55, %c0_56] : memref<64x32xbf16, #tpu.memory_space<vmem>>, vector<64x32xbf16>
    %c0_57 = arith.constant 0 : index
    %c0_58 = arith.constant 0 : index
    %108 = vector.load %arg5[%c0_57, %c0_58] : memref<32x32xbf16, #tpu.memory_space<vmem>>, vector<32x32xbf16>
    %cst_59 = arith.constant dense<0.000000e+00> : vector<64x32xf32>
    %109 = tpu.matmul %107, %108, %cst_59 {dimension_numbers = #tpu.dot_dimension_numbers<[1], [0], [0], [1], [0, 0, 1, 1], [], []>} : vector<64x32xbf16>, vector<32x32xbf16>, vector<64x32xf32> -> vector<64x32xf32>
    %c0_60 = arith.constant 0 : index
    %c0_61 = arith.constant 0 : index
    %110 = vector.load %arg6[%c0_60, %c0_61] : memref<1x32xf32, #tpu.memory_space<vmem>>, vector<1x32xf32>
    %111 = vector.broadcast %110 : vector<1x32xf32> to vector<64x32xf32>
    %112 = arith.addf %109, %111 : vector<64x32xf32>
    %c0_62 = arith.constant 0 : index
    %c0_63 = arith.constant 0 : index
    %113 = vector.load %arg9[%c0_62, %c0_63] : memref<8x32xf32, #tpu.memory_space<vmem>>, vector<8x32xf32>
    %114 = vector.extract_strided_slice %112 {offsets = [0, 0], sizes = [8, 32], strides = [1, 1]} : vector<64x32xf32> to vector<8x32xf32>
    %cst_64 = arith.constant 0.899999976 : f32
    %115 = vector.broadcast %cst_64 : f32 to vector<8x32xf32>
    %116 = arith.mulf %115, %113 : vector<8x32xf32>
    %117 = arith.addf %116, %114 : vector<8x32xf32>
    %cst_65 = arith.constant 1.000000e+00 : f32
    %118 = vector.broadcast %cst_65 : f32 to vector<8x32xf32>
    %119 = arith.cmpf ogt, %117, %118 : vector<8x32xf32>
    %120 = arith.extui %119 : vector<8x32xi1> to vector<8x32xi32>
    %121 = arith.sitofp %120 : vector<8x32xi32> to vector<8x32xf32>
    %122 = arith.truncf %121 : vector<8x32xf32> to vector<8x32xbf16>
    %c0_66 = arith.constant 0 : index
    %c0_67 = arith.constant 0 : index
    %c0_68 = arith.constant 0 : index
    %123 = vector.load %arg7[%c0_66, %c0_67, %c0_68] : memref<1x8x256xbf16, #tpu.memory_space<vmem>>, vector<1x8x32xbf16>
    %124 = vector.shape_cast %123 : vector<1x8x32xbf16> to vector<8x32xbf16>
    %125 = vector.shape_cast %122 : vector<8x32xbf16> to vector<1x8x32xbf16>
    tpu.vector_store %arg7[%c0_66, %c0_67, %c0_68], %125 {strides = array<i32>} : memref<1x8x256xbf16, #tpu.memory_space<vmem>>, vector<1x8x32xbf16>,
    %cst_69 = arith.constant 0.000000e+00 : f32
    %126 = vector.broadcast %cst_69 : f32 to vector<8x32xf32>
    %127 = arith.select %119, %126, %117 : vector<8x32xi1>, vector<8x32xf32>
    %128 = vector.extract_strided_slice %112 {offsets = [8, 0], sizes = [8, 32], strides = [1, 1]} : vector<64x32xf32> to vector<8x32xf32>
    %cst_70 = arith.constant 0.899999976 : f32
    %129 = vector.broadcast %cst_70 : f32 to vector<8x32xf32>
    %130 = arith.mulf %129, %127 : vector<8x32xf32>
    %131 = arith.addf %130, %128 : vector<8x32xf32>
    %cst_71 = arith.constant 1.000000e+00 : f32
    %132 = vector.broadcast %cst_71 : f32 to vector<8x32xf32>
    %133 = arith.cmpf ogt, %131, %132 : vector<8x32xf32>
    %134 = arith.extui %133 : vector<8x32xi1> to vector<8x32xi32>
    %135 = arith.sitofp %134 : vector<8x32xi32> to vector<8x32xf32>
    %136 = arith.truncf %135 : vector<8x32xf32> to vector<8x32xbf16>
    %c0_72 = arith.constant 0 : index
    %c0_73 = arith.constant 0 : index
    %c32_74 = arith.constant 32 : index
    %137 = vector.load %arg7[%c0_72, %c0_73, %c32_74] : memref<1x8x256xbf16, #tpu.memory_space<vmem>>, vector<1x8x32xbf16>
    %138 = vector.shape_cast %137 : vector<1x8x32xbf16> to vector<8x32xbf16>
    %139 = vector.shape_cast %136 : vector<8x32xbf16> to vector<1x8x32xbf16>
    tpu.vector_store %arg7[%c0_72, %c0_73, %c32_74], %139 {strides = array<i32>} : memref<1x8x256xbf16, #tpu.memory_space<vmem>>, vector<1x8x32xbf16>,
    %cst_75 = arith.constant 0.000000e+00 : f32
    %140 = vector.broadcast %cst_75 : f32 to vector<8x32xf32>
    %141 = arith.select %133, %140, %131 : vector<8x32xi1>, vector<8x32xf32>
    %142 = vector.extract_strided_slice %112 {offsets = [16, 0], sizes = [8, 32], strides = [1, 1]} : vector<64x32xf32> to vector<8x32xf32>
    %cst_76 = arith.constant 0.899999976 : f32
    %143 = vector.broadcast %cst_76 : f32 to vector<8x32xf32>
    %144 = arith.mulf %143, %141 : vector<8x32xf32>
    %145 = arith.addf %144, %142 : vector<8x32xf32>
    %cst_77 = arith.constant 1.000000e+00 : f32
    %146 = vector.broadcast %cst_77 : f32 to vector<8x32xf32>
    %147 = arith.cmpf ogt, %145, %146 : vector<8x32xf32>
    %148 = arith.extui %147 : vector<8x32xi1> to vector<8x32xi32>
    %149 = arith.sitofp %148 : vector<8x32xi32> to vector<8x32xf32>
    %150 = arith.truncf %149 : vector<8x32xf32> to vector<8x32xbf16>
    %c0_78 = arith.constant 0 : index
    %c0_79 = arith.constant 0 : index
    %c64 = arith.constant 64 : index
    %151 = vector.load %arg7[%c0_78, %c0_79, %c64] : memref<1x8x256xbf16, #tpu.memory_space<vmem>>, vector<1x8x32xbf16>
    %152 = vector.shape_cast %151 : vector<1x8x32xbf16> to vector<8x32xbf16>
    %153 = vector.shape_cast %150 : vector<8x32xbf16> to vector<1x8x32xbf16>
    tpu.vector_store %arg7[%c0_78, %c0_79, %c64], %153 {strides = array<i32>} : memref<1x8x256xbf16, #tpu.memory_space<vmem>>, vector<1x8x32xbf16>,
    %cst_80 = arith.constant 0.000000e+00 : f32
    %154 = vector.broadcast %cst_80 : f32 to vector<8x32xf32>
    %155 = arith.select %147, %154, %145 : vector<8x32xi1>, vector<8x32xf32>
    %156 = vector.extract_strided_slice %112 {offsets = [24, 0], sizes = [8, 32], strides = [1, 1]} : vector<64x32xf32> to vector<8x32xf32>
    %cst_81 = arith.constant 0.899999976 : f32
    %157 = vector.broadcast %cst_81 : f32 to vector<8x32xf32>
    %158 = arith.mulf %157, %155 : vector<8x32xf32>
    %159 = arith.addf %158, %156 : vector<8x32xf32>
    %cst_82 = arith.constant 1.000000e+00 : f32
    %160 = vector.broadcast %cst_82 : f32 to vector<8x32xf32>
    %161 = arith.cmpf ogt, %159, %160 : vector<8x32xf32>
    %162 = arith.extui %161 : vector<8x32xi1> to vector<8x32xi32>
    %163 = arith.sitofp %162 : vector<8x32xi32> to vector<8x32xf32>
    %164 = arith.truncf %163 : vector<8x32xf32> to vector<8x32xbf16>
    %c0_83 = arith.constant 0 : index
    %c0_84 = arith.constant 0 : index
    %c96 = arith.constant 96 : index
    %165 = vector.load %arg7[%c0_83, %c0_84, %c96] : memref<1x8x256xbf16, #tpu.memory_space<vmem>>, vector<1x8x32xbf16>
    %166 = vector.shape_cast %165 : vector<1x8x32xbf16> to vector<8x32xbf16>
    %167 = vector.shape_cast %164 : vector<8x32xbf16> to vector<1x8x32xbf16>
    tpu.vector_store %arg7[%c0_83, %c0_84, %c96], %167 {strides = array<i32>} : memref<1x8x256xbf16, #tpu.memory_space<vmem>>, vector<1x8x32xbf16>,
    %cst_85 = arith.constant 0.000000e+00 : f32
    %168 = vector.broadcast %cst_85 : f32 to vector<8x32xf32>
    %169 = arith.select %161, %168, %159 : vector<8x32xi1>, vector<8x32xf32>
    %170 = vector.extract_strided_slice %112 {offsets = [32, 0], sizes = [8, 32], strides = [1, 1]} : vector<64x32xf32> to vector<8x32xf32>
    %cst_86 = arith.constant 0.899999976 : f32
    %171 = vector.broadcast %cst_86 : f32 to vector<8x32xf32>
    %172 = arith.mulf %171, %169 : vector<8x32xf32>
    %173 = arith.addf %172, %170 : vector<8x32xf32>
    %cst_87 = arith.constant 1.000000e+00 : f32
    %174 = vector.broadcast %cst_87 : f32 to vector<8x32xf32>
    %175 = arith.cmpf ogt, %173, %174 : vector<8x32xf32>
    %176 = arith.extui %175 : vector<8x32xi1> to vector<8x32xi32>
    %177 = arith.sitofp %176 : vector<8x32xi32> to vector<8x32xf32>
    %178 = arith.truncf %177 : vector<8x32xf32> to vector<8x32xbf16>
    %c0_88 = arith.constant 0 : index
    %c0_89 = arith.constant 0 : index
    %c128 = arith.constant 128 : index
    %179 = vector.load %arg7[%c0_88, %c0_89, %c128] : memref<1x8x256xbf16, #tpu.memory_space<vmem>>, vector<1x8x32xbf16>
    %180 = vector.shape_cast %179 : vector<1x8x32xbf16> to vector<8x32xbf16>
    %181 = vector.shape_cast %178 : vector<8x32xbf16> to vector<1x8x32xbf16>
    tpu.vector_store %arg7[%c0_88, %c0_89, %c128], %181 {strides = array<i32>} : memref<1x8x256xbf16, #tpu.memory_space<vmem>>, vector<1x8x32xbf16>,
    %cst_90 = arith.constant 0.000000e+00 : f32
    %182 = vector.broadcast %cst_90 : f32 to vector<8x32xf32>
    %183 = arith.select %175, %182, %173 : vector<8x32xi1>, vector<8x32xf32>
    %184 = vector.extract_strided_slice %112 {offsets = [40, 0], sizes = [8, 32], strides = [1, 1]} : vector<64x32xf32> to vector<8x32xf32>
    %cst_91 = arith.constant 0.899999976 : f32
    %185 = vector.broadcast %cst_91 : f32 to vector<8x32xf32>
    %186 = arith.mulf %185, %183 : vector<8x32xf32>
    %187 = arith.addf %186, %184 : vector<8x32xf32>
    %cst_92 = arith.constant 1.000000e+00 : f32
    %188 = vector.broadcast %cst_92 : f32 to vector<8x32xf32>
    %189 = arith.cmpf ogt, %187, %188 : vector<8x32xf32>
    %190 = arith.extui %189 : vector<8x32xi1> to vector<8x32xi32>
    %191 = arith.sitofp %190 : vector<8x32xi32> to vector<8x32xf32>
    %192 = arith.truncf %191 : vector<8x32xf32> to vector<8x32xbf16>
    %c0_93 = arith.constant 0 : index
    %c0_94 = arith.constant 0 : index
    %c160 = arith.constant 160 : index
    %193 = vector.load %arg7[%c0_93, %c0_94, %c160] : memref<1x8x256xbf16, #tpu.memory_space<vmem>>, vector<1x8x32xbf16>
    %194 = vector.shape_cast %193 : vector<1x8x32xbf16> to vector<8x32xbf16>
    %195 = vector.shape_cast %192 : vector<8x32xbf16> to vector<1x8x32xbf16>
    tpu.vector_store %arg7[%c0_93, %c0_94, %c160], %195 {strides = array<i32>} : memref<1x8x256xbf16, #tpu.memory_space<vmem>>, vector<1x8x32xbf16>,
    %cst_95 = arith.constant 0.000000e+00 : f32
    %196 = vector.broadcast %cst_95 : f32 to vector<8x32xf32>
    %197 = arith.select %189, %196, %187 : vector<8x32xi1>, vector<8x32xf32>
    %198 = vector.extract_strided_slice %112 {offsets = [48, 0], sizes = [8, 32], strides = [1, 1]} : vector<64x32xf32> to vector<8x32xf32>
    %cst_96 = arith.constant 0.899999976 : f32
    %199 = vector.broadcast %cst_96 : f32 to vector<8x32xf32>
    %200 = arith.mulf %199, %197 : vector<8x32xf32>
    %201 = arith.addf %200, %198 : vector<8x32xf32>
    %cst_97 = arith.constant 1.000000e+00 : f32
    %202 = vector.broadcast %cst_97 : f32 to vector<8x32xf32>
    %203 = arith.cmpf ogt, %201, %202 : vector<8x32xf32>
    %204 = arith.extui %203 : vector<8x32xi1> to vector<8x32xi32>
    %205 = arith.sitofp %204 : vector<8x32xi32> to vector<8x32xf32>
    %206 = arith.truncf %205 : vector<8x32xf32> to vector<8x32xbf16>
    %c0_98 = arith.constant 0 : index
    %c0_99 = arith.constant 0 : index
    %c192 = arith.constant 192 : index
    %207 = vector.load %arg7[%c0_98, %c0_99, %c192] : memref<1x8x256xbf16, #tpu.memory_space<vmem>>, vector<1x8x32xbf16>
    %208 = vector.shape_cast %207 : vector<1x8x32xbf16> to vector<8x32xbf16>
    %209 = vector.shape_cast %206 : vector<8x32xbf16> to vector<1x8x32xbf16>
    tpu.vector_store %arg7[%c0_98, %c0_99, %c192], %209 {strides = array<i32>} : memref<1x8x256xbf16, #tpu.memory_space<vmem>>, vector<1x8x32xbf16>,
    %cst_100 = arith.constant 0.000000e+00 : f32
    %210 = vector.broadcast %cst_100 : f32 to vector<8x32xf32>
    %211 = arith.select %203, %210, %201 : vector<8x32xi1>, vector<8x32xf32>
    %212 = vector.extract_strided_slice %112 {offsets = [56, 0], sizes = [8, 32], strides = [1, 1]} : vector<64x32xf32> to vector<8x32xf32>
    %cst_101 = arith.constant 0.899999976 : f32
    %213 = vector.broadcast %cst_101 : f32 to vector<8x32xf32>
    %214 = arith.mulf %213, %211 : vector<8x32xf32>
    %215 = arith.addf %214, %212 : vector<8x32xf32>
    %cst_102 = arith.constant 1.000000e+00 : f32
    %216 = vector.broadcast %cst_102 : f32 to vector<8x32xf32>
    %217 = arith.cmpf ogt, %215, %216 : vector<8x32xf32>
    %218 = arith.extui %217 : vector<8x32xi1> to vector<8x32xi32>
    %219 = arith.sitofp %218 : vector<8x32xi32> to vector<8x32xf32>
    %220 = arith.truncf %219 : vector<8x32xf32> to vector<8x32xbf16>
    %c0_103 = arith.constant 0 : index
    %c0_104 = arith.constant 0 : index
    %c224 = arith.constant 224 : index
    %221 = vector.load %arg7[%c0_103, %c0_104, %c224] : memref<1x8x256xbf16, #tpu.memory_space<vmem>>, vector<1x8x32xbf16>
    %222 = vector.shape_cast %221 : vector<1x8x32xbf16> to vector<8x32xbf16>
    %223 = vector.shape_cast %220 : vector<8x32xbf16> to vector<1x8x32xbf16>
    tpu.vector_store %arg7[%c0_103, %c0_104, %c224], %223 {strides = array<i32>} : memref<1x8x256xbf16, #tpu.memory_space<vmem>>, vector<1x8x32xbf16>,
    %cst_105 = arith.constant 0.000000e+00 : f32
    %224 = vector.broadcast %cst_105 : f32 to vector<8x32xf32>
    %225 = arith.select %217, %224, %215 : vector<8x32xi1>, vector<8x32xf32>
    %c0_106 = arith.constant 0 : index
    %c0_107 = arith.constant 0 : index
    %226 = vector.load %arg9[%c0_106, %c0_107] : memref<8x32xf32, #tpu.memory_space<vmem>>, vector<8x32xf32>
    tpu.vector_store %arg9[%c0_106, %c0_107], %225 {strides = array<i32>} : memref<8x32xf32, #tpu.memory_space<vmem>>, vector<8x32xf32>,
    return
  }
  func.func @transform_0(%arg0: i32, %arg1: i32) -> (i32, i32, i32) {
    %c0_i32 = arith.constant 0 : i32
    %0 = arith.minsi %arg1, %c0_i32 : i32
    %c0_i32_0 = arith.constant 0 : i32
    %c0_i32_1 = arith.constant 0 : i32
    return %0, %arg0, %c0_i32_0 : i32, i32, i32
  }
  func.func @transform_1(%arg0: i32, %arg1: i32) -> (i32, i32) {
    %c0_i32 = arith.constant 0 : i32
    %c0_i32_0 = arith.constant 0 : i32
    %c0_i32_1 = arith.constant 0 : i32
    return %c0_i32, %c0_i32_0 : i32, i32
  }
  func.func @transform_2(%arg0: i32, %arg1: i32) -> (i32, i32) {
    %c0_i32 = arith.constant 0 : i32
    %c0_i32_0 = arith.constant 0 : i32
    %c0_i32_1 = arith.constant 0 : i32
    return %c0_i32, %c0_i32_0 : i32, i32
  }
  func.func @transform_3(%arg0: i32, %arg1: i32) -> (i32, i32) {
    %c0_i32 = arith.constant 0 : i32
    %c0_i32_0 = arith.constant 0 : i32
    %c0_i32_1 = arith.constant 0 : i32
    return %c0_i32, %c0_i32_0 : i32, i32
  }
  func.func @transform_4(%arg0: i32, %arg1: i32) -> (i32, i32) {
    %c0_i32 = arith.constant 0 : i32
    %c0_i32_0 = arith.constant 0 : i32
    %c0_i32_1 = arith.constant 0 : i32
    return %c0_i32, %c0_i32_0 : i32, i32
  }
  func.func @transform_5(%arg0: i32, %arg1: i32) -> (i32, i32, i32) {
    %c0_i32 = arith.constant 0 : i32
    %c0_i32_0 = arith.constant 0 : i32
    return %arg1, %arg0, %c0_i32 : i32, i32, i32
  }
}

</mosaic_0001>

<bundles_post_ra>
// kernel: tpu_custom_call.1
= control target key start
LH: loop header
LB: loop body
LE: loop exit
PB: predicated region body
PF: predicated region fallthrough
CT: control target
= control target key end

     0   :  { %s1631_s0 = inlined_call_operand.hbm [shape: bf16[8,16,32], index: 0, kind: input, shape index: {}]   ;;  %s1632_s1 = inlined_call_operand.hbm [shape: bf16[32,32], index: 1, kind: input, shape index: {}]   ;;  %s1633_s2 = inlined_call_operand.vmem [shape: f32[1,32], index: 2, kind: input, shape index: {}]   ;;  %s1634_s3 = inlined_call_operand.hbm [shape: bf16[32,32], index: 3, kind: input, shape index: {}]   ;;  %s1635_s4 = inlined_call_operand.vmem [shape: f32[1,32], index: 4, kind: input, shape index: {}]   ;;  %s1636_s5 = inlined_call_operand.hbm [shape: bf16[3,16,256], index: 5, kind: output, shape index: {}]  }
   0x1   :  { %1647 = sst [smem:[#allocation22_spill]] %s1632_s1 }
   0x2   :  { %1648 = sst [smem:[#allocation23_spill]] %s1634_s3 }
   0x3   :  { %1649 = sst [smem:[#allocation24_spill]] %s1636_s5 }
   0x4   :  { %10 = vsyncpa [#allocation7], 0 }
   0x5   :  { %12 = vsyncpa [#allocation7 + $0x1], 0 }
   0x6   :  { %13 = vsyncpa [#allocation10], 0 }
   0x7   :  { %14 = vsyncpa [#allocation8], 0 }
   0x8   :  { %16 = vsyncpa [#allocation8 + $0x1], 0  ;;  %s1327_s18 = smov 0   ;;  %s1329_s19 = smov 0  }
   0x9   :  { %s1331_s20 = smov 0   ;;  %s1333_s21 = smov 0  }
   0xa   :  { %s1335_s22 = smov 0   ;;  %s1337_s23 = smov 0  }
   0xb   :  { %s1339_s24 = smov 0   ;;  %s1341_s25 = smov 0  }
   0xc   :  { %s1343_s26 = smov 0   ;;  %s1345_s27 = smov 0  }
   0xd   :  { %s1347_s28 = smov 0  }
   0xe LB: > { %1650 = sst [smem:[#allocation16_spill]] %s1245_s18  ;;  %s814_s29 = sadd.s32 4294967295, %s1285_s28   ;;  %s1285_s28 = sphi %s1347_s28, %s22_s28   ;;  %s1281_s27 = sphi %s1345_s27, %s1682_s27   ;;  %s1277_s26 = sphi %s1343_s26, %s1673_s26   ;;  %s1273_s25 = sphi %s1341_s25, %s1681_s25   ;;  %s1269_s24 = sphi %s1339_s24, %s1672_s24   ;;  %s1265_s23 = sphi %s1337_s23, %s1680_s23   ;;  %s1261_s22 = sphi %s1335_s22, %s1679_s22   ;;  %s1257_s21 = sphi %s1333_s21, %s1678_s21   ;;  %s1253_s20 = sphi %s1331_s20, %s1677_s20   ;;  %s1249_s19 = sphi %s1329_s19, %s1676_s19   ;;  %s1245_s18 = sphi %s1327_s18, %s1675_s18  }
   0xf   : > { %1651 = sst [smem:[#allocation17_spill]] %s1277_s26  ;;  %s815_s30 = sadd.s32 4294967294, %s1285_s28  }
  0x10   : > { %p60_p0 = scmp.ne.s32.totalorder %s1261_s22, %s1257_s21  ;;  %p1383_p1 = scmp.eq.s32.totalorder %s814_s29, 0 }
  0x11   : > { %p169_p2 = scmp.ne.s32.totalorder %s1253_s20, %s1249_s19  ;;  %p170_p4 = scmp.eq.s32.totalorder %s814_s29, 5 }
  0x12   : > { %p1392_p3 = por %p1383_p1, %p60_p0  ;;  %p175_p5 = scmp.ne.s32.totalorder %s1249_s19, %s1245_s18 }
  0x13   : > { %p176_p6 = scmp.eq.s32.totalorder %s815_s30, 5  ;;  %p1398_p7 = por %p170_p4, %p169_p2 }
  0x14   : > { %p816_p8 = scmp.ge.s32.totalorder %s1285_s28, 1  ;;  %p183_p10 = scmp.lt.s32.totalorder %s1285_s28, 7 }
  0x15   : > { %s1654_s9 = scalar_select %p1398_p7, 1, 0 }
  0x16   : > { %p1403_p9 = por %p176_p6, %p175_p5  ;;  %s1658_s1 = sld [smem:[#allocation22_spill]] }
  0x17   : > { %1655 = sst [smem:[#allocation18_spill]] %s1654_s9  ;;  %p1411_p11 = pnand %p816_p8, %p183_p10 }
  0x18   : > { %s1656_s10 = scalar_select %p1403_p9, 1, 0 }
  0x19   : > { %p947_p12 = pneg %p1411_p11  ;;  %s1287_s15 = smov [#allocation9]  }
  0x1a   : > { %1657 = sst [smem:[#allocation19_spill]] %s1656_s10  ;;  %s196_s16 = sshll.u32 %s1287_s15, 4  ;;  %s197_s16 = int_to_ptr.vmem [resolvable:$true] %s196_s16 }
  0x1b   : > { %p948_p13 = pnand %p947_p12, %p1383_p1  ;;  %s1660_s3 = sld [smem:[#allocation23_spill]] }
  0x1c   : > { %s194_s13 = sshll.u32 %s1658_s1, 4  ;;  %s1637_s30 = smov 64   ;;  %s195_s13 = int_to_ptr.hbm [resolvable:$true] %s194_s13 }
  0x1d   : > { %s1638_s11 = smov 4   ;;  %s1290_s12 = smov [#allocation11]  }
  0x1e   : > { %950 = dma.hbm_to_vmem [thread:$0]  (!%p948_p13), %s195_s13, 256, %s197_s16, [#allocation10], %s1637_s30, %s1637_s30, %s1638_s11  }
  0x1f   : > { %s213_s15 = sshll.u32 %s1290_s12, 4  ;;  %s31_s17 = sadd.s32 1, %s1277_s26  ;;  %s214_s15 = int_to_ptr.vmem [resolvable:$true] %s213_s15 }
  0x20   : > { %s34_s21 = sadd.s32 1, %s1281_s27  ;;  %p32_p0 = scmp.ge.s32.totalorder %s31_s17, 3 }
  0x21   : > { %s211_s29 = sshll.u32 %s1660_s3, 4  ;;  %s47_s7 = sadd.s32 1, %s1265_s23  ;;  %s212_s29 = int_to_ptr.hbm [resolvable:$true] %s211_s29 }
  0x22   : > { %953 = dma.hbm_to_vmem [thread:$0]  (!%p948_p13), %s212_s29, 256, %s214_s15, [#allocation10], %s1637_s30, %s1637_s30, %s1638_s11  }
  0x23   : > { %p54_p2 = scmp.ne.s32.totalorder %s1265_s23, %s1261_s22  ;;  %s1684_s17 = smov (%p32_p0, %s31_s17), 0 }
  0x24   : > { %1661 = sst [smem:[#allocation20_spill]] %s1684_s17  ;;  %s1686_s21 = smov (!%p32_p0, %s34_s21), %s1281_s27 }
  0x25   : > { %p36_p4 = scmp.ge.s32.totalorder %s1686_s21, 2  ;;  %p55_p5 = scmp.eq.s32.totalorder %s1285_s28, 0 }
  0x26   : > { %s154_s13 = ssub.s32 %s1277_s26, %s1684_s17  ;;  %p964_p12 = scmp.lt.s32.totalorder %s1285_s28, 6 }
  0x27   : > { %s1688_s21 = smov (%p36_p4, %s1686_s21), 0  ;;  %p1443_p6 = por %p55_p5, %p54_p2 }
  0x28   : > { %1662 = sst [smem:[#allocation21_spill]] %s1688_s21  ;;  %s43_s16 = ssub.s32 %s1281_s27, %s1688_s21 }
  0x29   : > { %s156_s12 = sor.u32 %s154_s13, %s43_s16  ;;  %p45_p10 = scmp.eq.s32.totalorder %s43_s16, 0 }
  0x2a   : > { %p157_p8 = scmp.eq.s32.totalorder %s156_s12, 0  ;;  %s1664_s15 = sadd.s32 1, %s1253_s20 }
  0x2b   : > { %s1454_s11 = scalar_select %p45_p10, %s1265_s23, %s47_s7  }
  0x2c   : > { %s1451_s30 = scalar_select %p157_p8, %s1253_s20, %s1664_s15  }
  0x2d   : > { %s230_s1 = sand.u32 1, %s1265_s23   ;;  %s823_s17 = sshll.u32 %s1281_s27, 2 }
  0x2e   : > { %s820_s3 = sshll.u32 %s230_s1, 5  ;;  %s243_s9 = scalar_lea.hbm %s1631_s0, %s823_s17 }
  0x2f   : > { %s234_s26 = scalar_lea.vmem [#allocation6], %s820_s3  ;;  %s244_s5 = sshll.u32 %s243_s9, 4  ;;  %s245_s5 = int_to_ptr.hbm [resolvable:$true] %s244_s5 }
  0x30   : > { %s246_s10 = sshll.u32 %s234_s26, 4  ;;  %p1463_p13 = pnand %p964_p12, %p1443_p6  ;;  %s247_s10 = int_to_ptr.vmem [resolvable:$true] %s246_s10 }
  0x31   : > { %s231_s7 = scalar_lea.sflag [#allocation7], %s230_s1  ;;  %s1129_s16 = sshra.s32 %s245_s5, 4  ;;  %s1130_s16 = int_to_ptr.hbm [resolvable:$true] %s1129_s16 }
  0x32   : > { %s1131_s12 = scalar_lea.hbm %s1130_s16, 32  ;;  %p1133_p2 = pneg %p1463_p13 }
  0x33   : > { %p1132_p0 = scmp.ne.s32.totalorder %s1130_s16, %s1131_s12  ;;  %s1136_s26 = scalar_lea.hbm %s1631_s0, 64 }
  0x34   : > { %p1138_p8 = scmp.lt.s32.totalorder %s1136_s26, %s1131_s12 }
  0x35   : > { %p1134_p4 = pnand %p1133_p2, %p1132_p0 }
  0x37   : > { %p1135_p5 = pneg %p1134_p4 }
  0x39   : > { %p1140_p6 = pnand %p1138_p8, %p1135_p5 }
  0x3b   : > { %1143 = shalt.err (!%p1140_p6)
}
  0x3c   : > { %s1291_s9 = smov 128   ;;  %s1666_s17 = smov 4  }
  0x3d   : > { %s1667_s1 = smov 64   ;;  %258 = sbr.rel (%p1411_p11) target bundleno = 575 (0x23f), region = 40 }
  0x3e   : > { %957 = dma.hbm_to_vmem [thread:$0]  (!%p1463_p13), %s245_s5, 512, %s247_s10, %s231_s7, %s1291_s9, %s1667_s1, %s1666_s17  }
  0x3f   : > { %s260_s21 = sand.u32 (!%p1411_p11), 1, %s1261_s22  }
  0x40   : > { %s825_s29 = sshll.u32 (!%p1411_p11), %s260_s21, 5  ;;  %s261_s15 = scalar_lea.sflag (!%p1411_p11), [#allocation7], %s260_s21 }
  0x41   : > { %s264_s16 = scalar_lea.vmem (!%p1411_p11), [#allocation6], %s825_s29 }
  0x42   : > { %1232 = dma.done.wait (%p1392_p3), %s261_s15, 512  }
  0x43   : > { %1234 = vsyncadd (%p1392_p3), %s261_s15, 4294966784 }
  0x44   : > { %1236 = dma.done.wait (%p1383_p1), [#allocation10], 512  }
  0x45   : > { %1238 = vsyncadd (%p1383_p1), [#allocation10], 4294966784  ;;  %s299_s5 = sand.u32 1, %s1249_s19   ;;  %p829_p11 = scmp.ne.s32.totalorder %s1269_s24, 0 }
  0x46   : > { %s828_s10 = sshll.u32 %s299_s5, 3 }
  0x47   : > { %s1490_s14 = scalar_lea.vmem [#allocation12], %s828_s10  ;;  %309 = sbr.rel (%p829_p11) target bundleno = 79 (0x4f), region = 56 }
  0x4c   : > { %vm310_vm0 = vcmask 261120   ;;  %v1292_v0 = vmov 0.0  }
  0x4d   : > { %311 = vst.msk [vmem:[#allocation2] sm:$0xff] %vm310_vm0, %v1292_v0 }
  0x4e   : > { %312 = vst.msk [vmem:[#allocation3] sm:$0xff] %vm310_vm0, %v1292_v0 }
  0x4f PF: > { %p830_p3 = scmp.ge.s32.totalorder %s1269_s24, 1 }
  0x51   : > { %316 = sbr.rel (%p830_p3) target bundleno = 239 (0xef), region = 60 }
  0x56   : > { %v916_v1 = vld [vmem:[#allocation9 + $0x8] sm:$0xff]  ;;  %v915_v2 = vld [vmem:[#allocation9] sm:$0xff]  ;;  %vm365_vm1 = vcmask 261120   ;;  %v913_v5 = vld [vmem:[%s264_s16 + $0x10] sm:$0xff] }
  0x57   : > { %384 = vmatpush.bf16.msra.mxu0 %v916_v1  ;;  %923 = vmatpush.bf16.msra.mxu1 %v916_v1  ;;  %v911_v3 = vld [vmem:[%s264_s16] sm:$0xff]  ;;  %v912_v4 = vld [vmem:[%s264_s16 + $0x8] sm:$0xff]  ;;  %v914_v6 = vld [vmem:[%s264_s16 + $0x18] sm:$0xff] }
  0x58   : > { %924 = vmatpush.bf16.msra.mxu2 %v916_v1  ;;  %925 = vmatpush.bf16.msra.mxu3 %v916_v1  ;;  %v1066_v7 = vld [vmem:[%s1633_s2] ss:$0 sm:$0xff] }
  0x5b   : > { %385 = vmatpush.bf16.msra.mxu0 %v915_v2  ;;  %926 = vmatpush.bf16.msra.mxu1 %v915_v2 }
  0x5c   : > { %927 = vmatpush.bf16.msra.mxu2 %v915_v2  ;;  %928 = vmatpush.bf16.msra.mxu3 %v915_v2 }
  0x5e   : > { %855 = vmatmul.msk.bf16.vlgmr.msra.gmra.mxu0 %vm365_vm1, %v911_v3  ;;  %856 = vmatmul.msk.bf16.vlgmr.msra.gmra.mxu1 %vm365_vm1, %v912_v4 }
  0x5f   : > { %857 = vmatmul.msk.bf16.vlgmr.msra.gmra.mxu2 %vm365_vm1, %v913_v5  ;;  %858 = vmatmul.msk.bf16.vlgmr.msra.gmra.mxu3 %vm365_vm1, %v914_v6 }
  0xdb   : > { %v387_v8 = vpop.f32.mrf.mxu0  ;;  %v392_v9 = vpop.f32.mrf.mxu1 }
  0xdc   : > { %v388_v10 = vadd.f32 %v1066_v7, %v387_v8  ;;  %v393_v11 = vadd.f32 %v1066_v7, %v392_v9 }
  0xde   : > { %407 = vst.msk [vmem:[#allocation4] sm:$0xff] %vm365_vm1, %v388_v10 }
  0xdf   : > { %409 = vst.msk [vmem:[#allocation4 + $0x10] sm:$0xff] %vm365_vm1, %v393_v11 }
  0xe2   : > { %v397_v12 = vpop.f32.mrf.mxu2  ;;  %v402_v13 = vpop.f32.mrf.mxu3 }
  0xe3   : > { %v398_v14 = vadd.f32 %v1066_v7, %v397_v12  ;;  %v403_v15 = vadd.f32 %v1066_v7, %v402_v13  ;;  %v389_v16 = vpop.f32.mrf.mxu0  ;;  %v394_v17 = vpop.f32.mrf.mxu1 }
  0xe4   : > { %v390_v18 = vadd.f32 %v1066_v7, %v389_v16  ;;  %v395_v19 = vadd.f32 %v1066_v7, %v394_v17 }
  0xe5   : > { %411 = vst.msk [vmem:[#allocation4 + $0x20] sm:$0xff] %vm365_vm1, %v398_v14 }
  0xe6   : > { %413 = vst.msk [vmem:[#allocation4 + $0x30] sm:$0xff] %vm365_vm1, %v403_v15 }
  0xe7   : > { %408 = vst.msk [vmem:[#allocation4 + $0x8] sm:$0xff] %vm365_vm1, %v390_v18 }
  0xe8   : > { %410 = vst.msk [vmem:[#allocation4 + $0x18] sm:$0xff] %vm365_vm1, %v395_v19 }
  0xea   : > { %v399_v20 = vpop.f32.mrf.mxu2  ;;  %v404_v21 = vpop.f32.mrf.mxu3 }
  0xeb   : > { %v400_v22 = vadd.f32 %v1066_v7, %v399_v20  ;;  %v405_v23 = vadd.f32 %v1066_v7, %v404_v21 }
  0xed   : > { %412 = vst.msk [vmem:[#allocation4 + $0x28] sm:$0xff] %vm365_vm1, %v400_v22 }
  0xee   : > { %414 = vst.msk [vmem:[#allocation4 + $0x38] sm:$0xff] %vm365_vm1, %v405_v23 }
  0xef PF: > { %p859_p1 = scmp.lt.s32.totalorder %s1269_s24, 1 }
  0xf1   : > { %418 = sbr.rel (%p859_p1) target bundleno = 255 (0xff), region = 64 }
  0xf6   : > { %v1067_v24 = vld [vmem:[%s1633_s2] ss:$0 sm:$0xff]  ;;  %vm423_vm2 = vcmask 261120  }
  0xf7   : > { %424 = vst.msk [vmem:[#allocation4] sm:$0xff] %vm423_vm2, %v1067_v24 }
  0xf8   : > { %425 = vst.msk [vmem:[#allocation4 + $0x8] sm:$0xff] %vm423_vm2, %v1067_v24 }
  0xf9   : > { %426 = vst.msk [vmem:[#allocation4 + $0x10] sm:$0xff] %vm423_vm2, %v1067_v24 }
  0xfa   : > { %427 = vst.msk [vmem:[#allocation4 + $0x18] sm:$0xff] %vm423_vm2, %v1067_v24 }
  0xfb   : > { %428 = vst.msk [vmem:[#allocation4 + $0x20] sm:$0xff] %vm423_vm2, %v1067_v24 }
  0xfc   : > { %429 = vst.msk [vmem:[#allocation4 + $0x28] sm:$0xff] %vm423_vm2, %v1067_v24 }
  0xfd   : > { %430 = vst.msk [vmem:[#allocation4 + $0x30] sm:$0xff] %vm423_vm2, %v1067_v24 }
  0xfe   : > { %431 = vst.msk [vmem:[#allocation4 + $0x38] sm:$0xff] %vm423_vm2, %v1067_v24 }
  0xff PF: > { %v922_v25 = vld [vmem:[#allocation11 + $0x8] sm:$0xff]  ;;  %v432_v26 = vld [vmem:[#allocation2] sm:$0xff]  ;;  %v433_v27 = vld [vmem:[#allocation4] sm:$0xff]  ;;  %v1293_v31 = vmov 0.0   ;;  %vm440_vm4 = vcmask 257024   ;;  %vm506_vm7 = vcmask 261120  }
 0x100   : > { %v434_v28 = vmul.f32 0.9, %v432_v26  ;;  %574 = vmatpush.bf16.msra.mxu0 %v922_v25  ;;  %v921_v29 = vld [vmem:[#allocation11] sm:$0xff]  ;;  %929 = vmatpush.bf16.msra.mxu1 %v922_v25  ;;  %v443_v34 = vld [vmem:[#allocation4 + $0x8] sm:$0xff]  ;;  %v597_v17 = vld [vmem:[#allocation3] sm:$0xff]  ;;  %s1294_s18 = smov 32  }
 0x101   : > { %930 = vmatpush.bf16.msra.mxu2 %v922_v25  ;;  %931 = vmatpush.bf16.msra.mxu3 %v922_v25  ;;  %v452_v40 = vld [vmem:[#allocation4 + $0x10] sm:$0xff]  ;;  %v461_v46 = vld [vmem:[#allocation4 + $0x18] sm:$0xff]  ;;  %v598_v19 = vmul.f32 0.9, %v597_v17  ;;  %s1295_s26 = smov 64   ;;  %s1296_s9 = smov 96  }
 0x102   : > { %v435_v30 = vadd.f32 %v434_v28, %v433_v27  ;;  %v470_v53 = vld [vmem:[#allocation4 + $0x20] sm:$0xff]  ;;  %v1537_v18 = vld [vmem:[%s1635_s4] ss:$0 sm:$0xff]  ;;  %s905_s17 = sshll.u32 %s1273_s25, 1  ;;  %s906_s1 = sshll.u32 %s1269_s24, 2 }
 0x103   : > { %v479_v59 = vld [vmem:[#allocation4 + $0x28] sm:$0xff]  ;;  %s702_s21 = sadd.s32 %s906_s1, %s905_s17  ;;  %s1668_s10 = sld [smem:[#allocation24_spill]] }
 0x104   : > { %vm436_vm3 = vcmp.gt.f32.partialorder %v435_v30, 1.0  ;;  %575 = vmatpush.bf16.msra.mxu0 %v921_v29  ;;  %932 = vmatpush.bf16.msra.mxu1 %v921_v29  ;;  %v488_v2 = vld [vmem:[#allocation4 + $0x30] sm:$0xff]  ;;  %s907_s29 = sshll.u32 %s702_s21, 2  ;;  %s706_s13 = sshll.u32 %s1490_s14, 4  ;;  %s707_s13 = int_to_ptr.vmem [resolvable:$true] %s706_s13 }
 0x105   : > { %v860_v32 = vsel %vm436_vm3, 1.0, %v1293_v31  ;;  %v442_v33 = vsel %vm436_vm3, 0.0, %v435_v30  ;;  %933 = vmatpush.bf16.msra.mxu2 %v921_v29  ;;  %934 = vmatpush.bf16.msra.mxu3 %v921_v29  ;;  %v497_v8 = vld [vmem:[#allocation4 + $0x38] sm:$0xff]  ;;  %s691_s24 = scalar_lea.sflag [#allocation8], %s299_s5 }
 0x106   : > { %v439_v35 = vpack.c.bf16 %v860_v32, %v860_v32  ;;  %v444_v36 = vmul.f32 0.9, %v442_v33 }
 0x108   : > { %441 = vst.msk [vmem:[#allocation5] sm:$0xf] %vm440_vm4, %v439_v35  ;;  %v445_v37 = vadd.f32 %v444_v36, %v443_v34 }
 0x109   : > { %s704_s8 = scalar_lea.hbm %s1668_s10, %s907_s29 }
 0x10a   : > { %vm446_vm5 = vcmp.gt.f32.partialorder %v445_v37, 1.0  ;;  %s708_s7 = sshll.u32 %s704_s8, 4  ;;  %s709_s7 = int_to_ptr.hbm [resolvable:$true] %s708_s7 }
 0x10b   : > { %v861_v38 = vsel %vm446_vm5, 1.0, %v1293_v31  ;;  %v451_v39 = vsel %vm446_vm5, 0.0, %v445_v37  ;;  %vm616_vm5 = vcmask 519424   ;;  %s1173_s25 = sshra.s32 %s709_s7, 4  ;;  %s1174_s25 = int_to_ptr.hbm [resolvable:$true] %s1173_s25 }
 0x10c   : > { %v449_v41 = vpack.c.bf16 %v861_v38, %v861_v38  ;;  %v453_v42 = vmul.f32 0.9, %v451_v39  ;;  %s1175_s12 = scalar_lea.hbm %s1174_s25, 8  ;;  %p1180_p0 = scmp.lt.s32.totalorder %s1174_s25, %s1668_s10 }
 0x10d   : > { %p1176_p10 = scmp.ne.s32.totalorder %s1174_s25, %s1175_s12 }
 0x10e   : > { %450 = vst.msk [vmem:[#allocation5 + $0x4] sm:$0xf] %vm440_vm4, %v449_v41  ;;  %v454_v43 = vadd.f32 %v453_v42, %v452_v40 }
 0x10f   : > { %p1177_p12 = pnand %p1176_p10, %p1398_p7 }
 0x110   : > { %vm455_vm6 = vcmp.gt.f32.partialorder %v454_v43, 1.0 }
 0x111   : > { %v862_v44 = vsel %vm455_vm6, 1.0, %v1293_v31  ;;  %v460_v45 = vsel %vm455_vm6, 0.0, %v454_v43  ;;  %vm629_vm6 = vcmask 781824   ;;  %p1178_p13 = pneg %p1177_p12 }
 0x112   : > { %v458_v47 = vpack.c.bf16 %v862_v44, %v862_v44  ;;  %v462_v48 = vmul.f32 0.9, %v460_v45 }
 0x114   : > { %459 = vst.msk [vmem:[#allocation5 + $0x8] sm:$0xf] %vm440_vm4, %v458_v47  ;;  %v463_v49 = vadd.f32 %v462_v48, %v461_v46 }
 0x115   : > { %v917_v50 = vld [vmem:[#allocation5] sm:$0xff] }
 0x116   : > { %vm464_vm8 = vcmp.gt.f32.partialorder %v463_v49, 1.0  ;;  %892 = vmatmul.msk.bf16.vlgmr.msra.gmra.mxu0 %vm506_vm7, %v917_v50 }
 0x117   : > { %v863_v51 = vsel %vm464_vm8, 1.0, %v1293_v31  ;;  %v469_v52 = vsel %vm464_vm8, 0.0, %v463_v49  ;;  %vm642_vm8 = vcmask 1044224  }
 0x118   : > { %v467_v54 = vpack.c.bf16 %v863_v51, %v863_v51  ;;  %v471_v55 = vmul.f32 0.9, %v469_v52 }
 0x11a   : > { %v472_v56 = vadd.f32 %v471_v55, %v470_v53  ;;  %468 = vst.msk [vmem:[#allocation5 + $0xc] sm:$0xf] %vm440_vm4, %v467_v54 }
 0x11c   : > { %vm473_vm9 = vcmp.gt.f32.partialorder %v472_v56, 1.0 }
 0x11d   : > { %v864_v57 = vsel %vm473_vm9, 1.0, %v1293_v31  ;;  %v478_v58 = vsel %vm473_vm9, 0.0, %v472_v56 }
 0x11e   : > { %v476_v60 = vpack.c.bf16 %v864_v57, %v864_v57  ;;  %v480_v61 = vmul.f32 0.9, %v478_v58 }
 0x120   : > { %477 = vst.msk [vmem:[#allocation5 + $0x10] sm:$0xf] %vm440_vm4, %v476_v60  ;;  %v481_v62 = vadd.f32 %v480_v61, %v479_v59 }
 0x121   : > { %v918_v63 = vld [vmem:[#allocation5 + $0x8] sm:$0xff] }
 0x122   : > { %vm482_vm10 = vcmp.gt.f32.partialorder %v481_v62, 1.0  ;;  %893 = vmatmul.msk.bf16.vlgmr.msra.gmra.mxu1 %vm506_vm7, %v918_v63 }
 0x123   : > { %v865_v0 = vsel %vm482_vm10, 1.0, %v1293_v31  ;;  %v487_v1 = vsel %vm482_vm10, 0.0, %v481_v62 }
 0x124   : > { %v485_v3 = vpack.c.bf16 %v865_v0, %v865_v0  ;;  %v489_v4 = vmul.f32 0.9, %v487_v1 }
 0x126   : > { %486 = vst.msk [vmem:[#allocation5 + $0x14] sm:$0xf] %vm440_vm4, %v485_v3  ;;  %v490_v5 = vadd.f32 %v489_v4, %v488_v2 }
 0x128   : > { %vm491_vm11 = vcmp.gt.f32.partialorder %v490_v5, 1.0 }
 0x129   : > { %v866_v6 = vsel %vm491_vm11, 1.0, %v1293_v31  ;;  %v496_v7 = vsel %vm491_vm11, 0.0, %v490_v5 }
 0x12a   : > { %v494_v9 = vpack.c.bf16 %v866_v6, %v866_v6  ;;  %v498_v10 = vmul.f32 0.9, %v496_v7 }
 0x12c   : > { %495 = vst.msk [vmem:[#allocation5 + $0x18] sm:$0xf] %vm440_vm4, %v494_v9  ;;  %v499_v11 = vadd.f32 %v498_v10, %v497_v8 }
 0x12d   : > { %v919_v12 = vld [vmem:[#allocation5 + $0x10] sm:$0xff] }
 0x12e   : > { %vm500_vm12 = vcmp.gt.f32.partialorder %v499_v11, 1.0  ;;  %894 = vmatmul.msk.bf16.vlgmr.msra.gmra.mxu2 %vm506_vm7, %v919_v12 }
 0x12f   : > { %v867_v13 = vsel %vm500_vm12, 1.0, %v1293_v31  ;;  %v505_v14 = vsel %vm500_vm12, 0.0, %v499_v11 }
 0x130   : > { %v503_v15 = vpack.c.bf16 %v867_v13, %v867_v13  ;;  %507 = vst.msk [vmem:[#allocation2] sm:$0xff] %vm506_vm7, %v505_v14 }
 0x132   : > { %504 = vst.msk [vmem:[#allocation5 + $0x1c] sm:$0xf] %vm440_vm4, %v503_v15 }
 0x139   : > { %v920_v16 = vld [vmem:[#allocation5 + $0x18] sm:$0xff] }
 0x13a   : > { %895 = vmatmul.msk.bf16.vlgmr.msra.gmra.mxu3 %vm506_vm7, %v920_v16 }
 0x193   : > { %v577_v20 = vpop.f32.mrf.mxu0 }
 0x194   : > { %v578_v21 = vadd.f32 %v1537_v18, %v577_v20 }
 0x196   : > { %v599_v22 = vadd.f32 %v598_v19, %v578_v21 }
 0x198   : > { %vm600_vm13 = vcmp.gt.f32.partialorder %v599_v22, 1.0 }
 0x199   : > { %v896_v23 = vsel %vm600_vm13, 1.0, %v1293_v31  ;;  %v605_v24 = vsel %vm600_vm13, 0.0, %v599_v22 }
 0x19a   : > { %v603_v25 = vpack.c.bf16 %v896_v23, %v896_v23  ;;  %v606_v26 = vmul.f32 0.9, %v605_v24 }
 0x19b   : > { %v579_v27 = vpop.f32.mrf.mxu0 }
 0x19c   : > { %604 = vst.msk [vmem:[%s1490_s14] sm:$0xf] %vm440_vm4, %v603_v25  ;;  %v580_v28 = vadd.f32 %v1537_v18, %v579_v27 }
 0x19e   : > { %v607_v29 = vadd.f32 %v606_v26, %v580_v28 }
 0x19f   : > { %v582_v30 = vpop.f32.mrf.mxu1 }
 0x1a0   : > { %vm608_vm14 = vcmp.gt.f32.partialorder %v607_v29, 1.0  ;;  %v583_v32 = vadd.f32 %v1537_v18, %v582_v30 }
 0x1a1   : > { %v618_v33 = vsel %vm608_vm14, 0.0, %v607_v29  ;;  %v897_v34 = vsel %vm608_vm14, 1.0, %v1293_v31 }
 0x1a2   : > { %v619_v35 = vmul.f32 0.9, %v618_v33  ;;  %v611_v36 = vpack.c.bf16 %v897_v34, %v897_v34 }
 0x1a4   : > { %v620_v37 = vadd.f32 %v619_v35, %v583_v32  ;;  %613 = vrot.lane.b32.xlu0 %v611_v36, %s1294_s18 }
 0x1a6   : > { %vm621_vm15 = vcmp.gt.f32.partialorder %v620_v37, 1.0 }
 0x1a7   : > { %v631_v38 = vsel %vm621_vm15, 0.0, %v620_v37  ;;  %v584_v39 = vpop.f32.mrf.mxu1  ;;  %v898_v40 = vsel %vm621_vm15, 1.0, %v1293_v31 }
 0x1a8   : > { %v585_v41 = vadd.f32 %v1537_v18, %v584_v39  ;;  %v632_v42 = vmul.f32 0.9, %v631_v38  ;;  %v624_v43 = vpack.c.bf16 %v898_v40, %v898_v40 }
 0x1aa   : > { %v633_v44 = vadd.f32 %v632_v42, %v585_v41  ;;  %626 = vrot.lane.b32.xlu1 %v624_v43, %s1295_s26 }
 0x1ac   : > { %vm634_vm0 = vcmp.gt.f32.partialorder %v633_v44, 1.0 }
 0x1ad   : > { %v899_v45 = vsel %vm634_vm0, 1.0, %v1293_v31  ;;  %v644_v47 = vsel %vm634_vm0, 0.0, %v633_v44 }
 0x1ae   : > { %v637_v46 = vpack.c.bf16 %v899_v45, %v899_v45  ;;  %v645_v49 = vmul.f32 0.9, %v644_v47 }
 0x1b0   : > { %639 = vrot.lane.b32.xlu2 %v637_v46, %s1296_s9 }
 0x1b1   : > { %v587_v48 = vpop.f32.mrf.mxu2 }
 0x1b2   : > { %v588_v50 = vadd.f32 %v1537_v18, %v587_v48 }
 0x1b4   : > { %v646_v51 = vadd.f32 %v645_v49, %v588_v50 }
 0x1b6   : > { %vm647_vm1 = vcmp.gt.f32.partialorder %v646_v51, 1.0 }
 0x1b7   : > { %v900_v52 = vsel %vm647_vm1, 1.0, %v1293_v31  ;;  %v652_v53 = vsel %vm647_vm1, 0.0, %v646_v51 }
 0x1b8   : > { %v650_v54 = vpack.c.bf16 %v900_v52, %v900_v52  ;;  %v653_v57 = vmul.f32 0.9, %v652_v53 }
 0x1b9   : > { %v589_v55 = vpop.f32.mrf.mxu2 }
 0x1ba   : > { %651 = vst.msk [vmem:[%s1490_s14 + $0x4] sm:$0xf] %vm440_vm4, %v650_v54  ;;  %v590_v56 = vadd.f32 %v1537_v18, %v589_v55 }
 0x1bc   : > { %v654_v58 = vadd.f32 %v653_v57, %v590_v56 }
 0x1bd   : > { %v592_v59 = vpop.f32.mrf.mxu3 }
 0x1be   : > { %vm655_vm2 = vcmp.gt.f32.partialorder %v654_v58, 1.0  ;;  %v593_v60 = vadd.f32 %v1537_v18, %v592_v59 }
 0x1bf   : > { %v664_v61 = vsel %vm655_vm2, 0.0, %v654_v58  ;;  %v901_v62 = vsel %vm655_vm2, 1.0, %v1293_v31 }
 0x1c0   : > { %v665_v63 = vmul.f32 0.9, %v664_v61  ;;  %v658_v0 = vpack.c.bf16 %v901_v62, %v901_v62 }
 0x1c2   : > { %v666_v1 = vadd.f32 %v665_v63, %v593_v60  ;;  %660 = vrot.lane.b32.xlu0 %v658_v0, %s1294_s18 }
 0x1c4   : > { %vm667_vm3 = vcmp.gt.f32.partialorder %v666_v1, 1.0 }
 0x1c5   : > { %v676_v2 = vsel %vm667_vm3, 0.0, %v666_v1  ;;  %v594_v3 = vpop.f32.mrf.mxu3  ;;  %v902_v4 = vsel %vm667_vm3, 1.0, %v1293_v31 }
 0x1c6   : > { %v595_v5 = vadd.f32 %v1537_v18, %v594_v3  ;;  %v677_v6 = vmul.f32 0.9, %v676_v2  ;;  %v670_v7 = vpack.c.bf16 %v902_v4, %v902_v4 }
 0x1c8   : > { %v678_v8 = vadd.f32 %v677_v6, %v595_v5  ;;  %672 = vrot.lane.b32.xlu1 %v670_v7, %s1295_s26  ;;  %s1179_s26 = scalar_lea.hbm %s1668_s10, 48 }
 0x1c9   : > { %p1181_p2 = scmp.lt.s32.totalorder %s1179_s26, %s1175_s12 }
 0x1ca   : > { %vm679_vm4 = vcmp.gt.f32.partialorder %v678_v8, 1.0 }
 0x1cb   : > { %v688_v9 = vsel %vm679_vm4, 0.0, %v678_v8  ;;  %v903_v10 = vsel %vm679_vm4, 1.0, %v1293_v31  ;;  %p1182_p4 = por %p1181_p2, %p1180_p0 }
 0x1cc   : > { %689 = vst.msk [vmem:[#allocation3] sm:$0xff] %vm506_vm7, %v688_v9  ;;  %v682_v11 = vpack.c.bf16 %v903_v10, %v903_v10 }
 0x1cd   : > { %p1183_p5 = pnand %p1182_p4, %p1178_p13 }
 0x1ce   : > { %684 = vrot.lane.b32.xlu2 %v682_v11, %s1296_s9 }
 0x20a   : > { %v640_v14 = vpop.permute.xlu2 %639 }
 0x216   : > { %v614_v12 = vpop.permute.xlu0 %613 }
 0x217   : > { %617 = vst.msk [vmem:[%s1490_s14] sm:$0xf] %vm616_vm5, %v614_v12 }
 0x21c   : > { %v627_v13 = vpop.permute.xlu1 %626 }
 0x21d   : > { %630 = vst.msk [vmem:[%s1490_s14] sm:$0xf] %vm629_vm6, %v627_v13 }
 0x21e   : > { %643 = vst.msk [vmem:[%s1490_s14] sm:$0xf] %vm642_vm8, %v640_v14 }
 0x228   : > { %v685_v16 = vpop.permute.xlu2 %684 }
 0x234   : > { %v661_v31 = vpop.permute.xlu0 %660 }
 0x235   : > { %663 = vst.msk [vmem:[%s1490_s14 + $0x4] sm:$0xf] %vm616_vm5, %v661_v31 }
 0x23a   : > { %v673_v15 = vpop.permute.xlu1 %672 }
 0x23b   : > { %675 = vst.msk [vmem:[%s1490_s14 + $0x4] sm:$0xf] %vm629_vm6, %v673_v15 }
 0x23c   : > { %687 = vst.msk [vmem:[%s1490_s14 + $0x4] sm:$0xf] %vm642_vm8, %v685_v16 }
 0x23d   : > { %1186 = shalt.err (!%p1183_p5)
}
 0x23e   : > { %945 = dma.vmem_to_hbm [thread:$0]  (%p1398_p7), %s707_s13, 128, %s709_s7, %s691_s24  }
 0x23f PF: > { %s1670_s5 = sld [smem:[#allocation16_spill]]  ;;  %p967_p8 = scmp.ge.s32.totalorder %s1285_s28, 2 }
 0x241   : > { %p959_p6 = pnand %p967_p8, %p1403_p9 }
 0x243   : > { %p960_p11 = pneg %p959_p6 }
 0x245   : > { %s720_s1 = sand.u32 1, %s1670_s5  }
 0x246   : > { %s721_s21 = scalar_lea.sflag [#allocation8], %s720_s1 }
 0x247   : > { %1240 = dma.done.wait (%p960_p11), %s721_s21, 128  }
 0x248   : > { %1242 = vsyncadd (%p960_p11), %s721_s21, 4294967168  ;;  %s22_s28 = sadd.s32 1, %s1285_s28   ;;  %s1672_s24 = sld [smem:[#allocation17_spill]] }
 0x249   : > { %p19_p3 = scmp.ge.s32.totalorder %s22_s28, 8   ;;  %s1673_s26 = sld [smem:[#allocation20_spill]] }
 0x24a   : > { %s1674_s29 = sld [smem:[#allocation21_spill]]  ;;  %s1675_s18 = smov %s1249_s19 }
 0x24b   : > { %s1676_s19 = smov %s1253_s20  ;;  %s1677_s20 = smov %s1451_s30 }
 0x24c   : > { %s1678_s21 = smov %s1261_s22  ;;  %s1679_s22 = smov %s1265_s23 }
 0x24d   : > { %s1680_s23 = smov %s1454_s11  ;;  %s1681_s25 = smov %s1281_s27 }
 0x24e   :  { %21 = sbr.rel (!%p19_p3) target bundleno = 14 (0xe), region = 105 }
 0x250   : > { %s1682_s27 = smov %s1674_s29 }
 0x253   :  { %727 = vsyncpa [#allocation7], 1 }
 0x254   :  { %729 = vsyncpa [#allocation7 + $0x1], 1 }
 0x255   :  { %730 = vsyncpa [#allocation10], 1 }
 0x256   :  { %731 = vsyncpa [#allocation8], 1 }
 0x257   :  { %733 = vsyncpa [#allocation8 + $0x1], 1 }

</bundles_post_ra>
